<compile_context>
chip_gen: v5e
topology: v5e:2x2
jax: 0.10.0
libtpu: 0.0.40
codegen_flags: <defaults>
</compile_context>

<pallas_src>
import jax
import jax.numpy as jnp
from jax.experimental import pallas as pl
from jax.experimental.pallas import tpu as pltpu


def _round_up(x, m):
    return ((x + m - 1) // m) * m


def _cdiv(a, b):
    return (a + b - 1) // b


def _vmem_capacity_bytes():
    """Per-core VMEM (128 MiB v5e/v6e, 64 MiB v7x); conservative fallback."""
    try:
        return int(pltpu.get_tpu_info().vmem_capacity_bytes)
    except Exception:
        return 64 * 1024 * 1024


# ---------------------------------------------------------------------------
# Kernels
# ---------------------------------------------------------------------------

def _proj_kernel_resident(a_ref, w_ref, b_ref, o_ref):
    """Weight-resident path: one whole-K dot per M tile.

    W's block index is constant over the grid, so it is DMA'd once and stays
    in VMEM.  Bias is added in the same statement; the only cast is the final
    store, so there is no accumulator RMW and no epilogue pass.
    """
    o_ref[...] = (
        jnp.dot(a_ref[...], w_ref[...], preferred_element_type=jnp.float32)
        + b_ref[...]
    ).astype(o_ref.dtype)


def _proj_kernel_ktiled(a_ref, w_ref, b_ref, o_ref, acc_ref):
    """K-tiled streaming path (used when W does not fit VMEM, e.g. v7x big-K).

    f32 accumulation lives in a VMEM scratch; bias is folded into the k == 0
    init; the output (possibly bf16) is written once in the last-K epilogue.
    """
    k = pl.program_id(1)

    @pl.when(k == 0)
    def _init():
        acc_ref[...] = jnp.broadcast_to(b_ref[...], acc_ref.shape)

    acc_ref[...] += jnp.dot(a_ref[...], w_ref[...],
                            preferred_element_type=jnp.float32)

    @pl.when(k == pl.num_programs(1) - 1)
    def _store():
        o_ref[...] = acc_ref[...].astype(o_ref.dtype)


# ---------------------------------------------------------------------------
# Tile / residency selection
# ---------------------------------------------------------------------------

def _pick_tm(m8, cap_tm):
    """Largest tile <= cap_tm (multiple of 8); prefer one dividing the row
    count so jnp.pad never copies the whole A matrix."""
    t = min(cap_tm, m8)
    if m8 % t:
        for cand in range(t, 127, -8):
            if m8 % cand == 0:
                return cand
    return t


def _choose_config(M, K, E, budget, tm_target=512):
    e_pad = _round_up(E, 128)
    m8 = _round_up(M, 8)
    k128 = _round_up(K, 128)
    bias_bytes = 2 * e_pad * 4
    tm_candidates = (tm_target, 256, 128, 64, 32, 16, 8)

    # Path 1: weight fully resident in VMEM (fetched once), single dot per M
    # tile.  W is budgeted at 2 pipeline buffers to be conservative.
    w_bytes = 2 * (k128 * e_pad * 2)
    for cap_tm in tm_candidates:
        tm = _pick_tm(m8, cap_tm)
        need = (w_bytes + bias_bytes
                + 2 * tm * k128 * 2        # double-buffered bf16 A tile
                + 2 * tm * e_pad * 4)      # double-buffered output tile
        if need <= budget:
            return {"mode": "resident", "tm": tm, "tk": k128, "e_pad": e_pad}

    # Path 2: K-tiled streaming GEMM (W re-streamed once per M tile, so take
    # tm as large as the budget allows).
    for tk in (2048, 1024, 512, 256, 128):
        tk = min(tk, k128)
        for cap_tm in (1024,) + tm_candidates:
            tm = _pick_tm(m8, cap_tm)
            need = (bias_bytes
                    + 2 * tm * tk * 2      # A tiles
                    + 2 * tk * e_pad * 2   # W tiles
                    + 2 * tm * e_pad * 4   # out tiles
                    + tm * e_pad * 4)      # f32 accumulator scratch
            if need <= budget:
                return {"mode": "ktiled", "tm": tm, "tk": tk, "e_pad": e_pad}

    return {"mode": "ktiled", "tm": min(8, m8), "tk": 128, "e_pad": e_pad}


# ---------------------------------------------------------------------------
# Patch-projection GEMM wrapper
# ---------------------------------------------------------------------------

def patch_proj_matmul(a, w, b, *, out_dtype=jnp.float32, mode=None, tm=None,
                      tk=None, tm_target=512):
    """a: (M, K) bf16 patch matrix, w: (K, E) bf16, b: (E,) f32 -> (M, E)."""
    M, K = a.shape
    K2, E = w.shape
    assert K2 == K, (K2, K)

    cap = _vmem_capacity_bytes()
    vmem_limit = int(cap * 0.80)        # headroom for Mosaic-internal scratch
    budget = int(vmem_limit * 0.85)     # what tile selection plans against

    cfg = _choose_config(M, K, E, budget, tm_target=tm_target)
    if mode is not None:
        cfg["mode"] = mode
    if tk is not None:
        cfg["tk"] = tk
    if tm is not None:
        cfg["tm"] = tm
    else:
        # v7x megacore: make sure the "parallel" M axis has >= 2 tiles so both
        # TensorCores get work (no effect on the 1-TC v5e/v6e generations).
        m8 = _round_up(M, 8)
        if _cdiv(m8, cfg["tm"]) < 2 and m8 >= 16:
            cfg["tm"] = _round_up(_cdiv(m8, 2), 8)

    tm_ = cfg["tm"]
    resident = cfg["mode"] == "resident"
    e_pad = _round_up(E, 128)

    if resident:
        k_pad = _round_up(K, 128)
        tk_ = k_pad
    else:
        tk_ = max(128, _round_up(min(cfg["tk"], _round_up(K, 128)), 128))
        k_pad = _round_up(K, tk_)
    m_pad = _round_up(M, tm_)

    # Zero-pad once (zeros contribute nothing to the GEMM; padded rows/cols
    # are sliced off below).  No-op when already aligned.
    if (m_pad, k_pad) != (M, K):
        a = jnp.pad(a, ((0, m_pad - M), (0, k_pad - K)))
    if (k_pad, e_pad) != (K, E):
        w = jnp.pad(w, ((0, k_pad - K), (0, e_pad - E)))
    b2 = b.astype(jnp.float32).reshape(1, E)
    if e_pad != E:
        b2 = jnp.pad(b2, ((0, 0), (0, e_pad - E)))

    if resident:
        grid = (m_pad // tm_,)
        kernel = _proj_kernel_resident
        in_specs = [
            pl.BlockSpec((tm_, k_pad), lambda i: (i, 0)),      # A tile (streamed)
            pl.BlockSpec((k_pad, e_pad), lambda i: (0, 0)),    # W (resident, DMA'd once)
            pl.BlockSpec((1, e_pad), lambda i: (0, 0)),        # bias
        ]
        out_specs = pl.BlockSpec((tm_, e_pad), lambda i: (i, 0))
        scratch = []
        dims = ("parallel",)
    else:
        grid = (m_pad // tm_, k_pad // tk_)
        kernel = _proj_kernel_ktiled
        in_specs = [
            pl.BlockSpec((tm_, tk_), lambda i, k: (i, k)),     # A tile
            pl.BlockSpec((tk_, e_pad), lambda i, k: (k, 0)),   # W tile (streamed)
            pl.BlockSpec((1, e_pad), lambda i, k: (0, 0)),     # bias
        ]
        out_specs = pl.BlockSpec((tm_, e_pad), lambda i, k: (i, 0))
        scratch = [pltpu.VMEM((tm_, e_pad), jnp.float32)]
        dims = ("parallel", "arbitrary")

    out = pl.pallas_call(
        kernel,
        out_shape=jax.ShapeDtypeStruct((m_pad, e_pad), out_dtype),
        grid_spec=pltpu.PrefetchScalarGridSpec(
            num_scalar_prefetch=0,
            grid=grid,
            in_specs=in_specs,
            out_specs=out_specs,
            scratch_shapes=scratch,
        ),
        compiler_params=pltpu.CompilerParams(
            dimension_semantics=dims,
            vmem_limit_bytes=vmem_limit,
        ),
    )(a, w, b2)

    if (m_pad, e_pad) != (M, E):
        out = out[:M, :E]
    return out


# ---------------------------------------------------------------------------
# Patch3DEmbed forward
# ---------------------------------------------------------------------------

def patch3d_embed(x, weight, bias, patch_size, *, compute_dtype=jnp.bfloat16,
                  out_dtype=None, **matmul_overrides):
    """Forward pass of Patch3DEmbed.

    x:      (B, C, H, W, L)           -- PyTorch NCDHW layout
    weight: (E, C, p0, p1, p2)        -- Conv3d weight
    bias:   (E,)                      -- Conv3d bias
    returns (B, N, E), N = (H//p0)*(W//p1)*(L//p2).  out_dtype defaults to
    x.dtype (float32 parity with PyTorch); pass jnp.bfloat16 to halve output
    HBM writes.
    """
    B, C, H, W, L = x.shape
    E = weight.shape[0]
    p0, p1, p2 = patch_size
    assert H % p0 == 0 and W % p1 == 0 and L % p2 == 0, (x.shape, patch_size)
    D0, D1, D2 = H // p0, W // p1, L // p2
    N = D0 * D1 * D2
    K = C * p0 * p1 * p2
    if out_dtype is None:
        out_dtype = x.dtype

    # Cast BEFORE the relayout so the patch-extraction transpose moves bf16
    # (half the HBM bytes); accumulation stays f32 in-kernel.
    xc = x.astype(compute_dtype)
    xp = xc.reshape(B, C, D0, p0, D1, p1, D2, p2)
    xp = xp.transpose(0, 2, 4, 6, 1, 3, 5, 7)      # (B, D0, D1, D2, C, p0, p1, p2)
    a = xp.reshape(B * N, K)                        # rows = patches in (d0,d1,d2) raster order

    wk = weight.astype(compute_dtype).reshape(E, K).T   # (K, E), cols in (c,i,j,k) order

    out = patch_proj_matmul(a, wk, bias, out_dtype=out_dtype, **matmul_overrides)
    return out.reshape(B, N, E)


if __name__ == "__main__":
    # Small, self-consistent shapes: img_size=16, patch_size=8, in_chans=4,
    # embed_dim=128, batch=2  ->  N = 2*2*2 = 8 patches, K = 4*8*8*8 = 2048.
    B, C = 2, 4
    IMG, P = 16, 8
    E = 128
    patch_size = (P, P, P)

    key = jax.random.PRNGKey(0)
    kx, kw, kb = jax.random.split(key, 3)
    x = jax.random.normal(kx, (B, C, IMG, IMG, IMG), dtype=jnp.float32)
    weight = jax.random.normal(kw, (E, C, P, P, P), dtype=jnp.float32) * 0.02
    bias = jax.random.normal(kb, (E,), dtype=jnp.float32) * 0.02

    # Default path: W resident in VMEM, single whole-K dot per M tile.
    out = jax.block_until_ready(patch3d_embed(x, weight, bias, patch_size))
    assert out.shape == (B, (IMG // P) ** 3, E), out.shape
    assert out.dtype == jnp.float32, out.dtype

    # Reference: same patch matmul in plain JAX, with the same bf16 input
    # cast + f32 accumulation the kernel uses.
    D = IMG // P
    xp = x.astype(jnp.bfloat16).reshape(B, C, D, P, D, P, D, P)
    xp = xp.transpose(0, 2, 4, 6, 1, 3, 5, 7)
    a_ref = xp.reshape(B * D * D * D, C * P * P * P).astype(jnp.float32)
    w_ref = weight.astype(jnp.bfloat16).reshape(E, -1).T.astype(jnp.float32)
    ref = (a_ref @ w_ref + bias).reshape(B, D * D * D, E)
    assert jnp.allclose(out, ref, atol=1e-2, rtol=1e-2)

    # Looser sanity check against the full-f32 (PyTorch-equivalent) math.
    a_f32 = x.reshape(B, C, D, P, D, P, D, P).transpose(0, 2, 4, 6, 1, 3, 5, 7)
    a_f32 = a_f32.reshape(B * D * D * D, C * P * P * P)
    ref_f32 = (a_f32 @ weight.reshape(E, -1).T + bias).reshape(B, D * D * D, E)
    assert jnp.allclose(out, ref_f32, atol=5e-2, rtol=5e-2)

    # K-tiled streaming fallback (the path v7x takes when W doesn't fit VMEM).
    out_kt = jax.block_until_ready(
        patch3d_embed(x, weight, bias, patch_size, mode="ktiled", tk=512))
    assert out_kt.shape == out.shape and out_kt.dtype == jnp.float32
    assert jnp.allclose(out, out_kt, atol=1e-3, rtol=1e-3)

    # Opt-in bf16 output (halves output HBM writes).
    out_bf16 = jax.block_until_ready(
        patch3d_embed(x, weight, bias, patch_size, out_dtype=jnp.bfloat16))
    assert out_bf16.dtype == jnp.bfloat16
    assert jnp.allclose(out_bf16.astype(jnp.float32), out, atol=3e-2, rtol=3e-2)

    print("KERNEL_OK")
</pallas_src>

<mosaic_0001>
module attributes {stable_mosaic.version = 11 : i64} {
  func.func @_proj_kernel_resident(%arg0: i32, %arg1: memref<8x2048xbf16, #tpu.memory_space<vmem>>, %arg2: memref<2048x128xbf16, #tpu.memory_space<vmem>>, %arg3: memref<1x128xf32, #tpu.memory_space<vmem>>, %arg4: memref<8x128xf32, #tpu.memory_space<vmem>>) attributes {dimension_semantics = [#tpu.dimension_semantics<parallel>], iteration_bounds = array<i64: 2>, scalar_prefetch = 0 : i64, scratch_operands = 0 : i64, tpu.core_type = #tpu.core_type<tc>, window_params = [{transform_indices = @transform_0, window_bounds = array<i64: 8, 2048>}, {pipeline_mode = #tpu.pipeline_mode<synchronous>, transform_indices = @transform_1, window_bounds = array<i64: 2048, 128>}, {pipeline_mode = #tpu.pipeline_mode<synchronous>, transform_indices = @transform_2, window_bounds = array<i64: 1, 128>}, {transform_indices = @transform_3, window_bounds = array<i64: 8, 128>}]} {
    %c0 = arith.constant 0 : index
    %c0_0 = arith.constant 0 : index
    %0 = vector.load %arg1[%c0, %c0_0] : memref<8x2048xbf16, #tpu.memory_space<vmem>>, vector<8x2048xbf16>
    %c0_1 = arith.constant 0 : index
    %c0_2 = arith.constant 0 : index
    %1 = vector.load %arg2[%c0_1, %c0_2] : memref<2048x128xbf16, #tpu.memory_space<vmem>>, vector<2048x128xbf16>
    %cst = arith.constant dense<0.000000e+00> : vector<8x128xf32>
    %2 = tpu.matmul %0, %1, %cst {dimension_numbers = #tpu.dot_dimension_numbers<[1], [0], [0], [1], [0, 0, 1, 1], [], []>} : vector<8x2048xbf16>, vector<2048x128xbf16>, vector<8x128xf32> -> vector<8x128xf32>
    %c0_3 = arith.constant 0 : index
    %c0_4 = arith.constant 0 : index
    %3 = vector.load %arg3[%c0_3, %c0_4] : memref<1x128xf32, #tpu.memory_space<vmem>>, vector<1x128xf32>
    %4 = vector.broadcast %3 : vector<1x128xf32> to vector<8x128xf32>
    %5 = arith.addf %2, %4 : vector<8x128xf32>
    %c0_5 = arith.constant 0 : index
    %c0_6 = arith.constant 0 : index
    %6 = vector.load %arg4[%c0_5, %c0_6] : memref<8x128xf32, #tpu.memory_space<vmem>>, vector<8x128xf32>
    tpu.vector_store %arg4[%c0_5, %c0_6], %5 {strides = array<i32>} : memref<8x128xf32, #tpu.memory_space<vmem>>, vector<8x128xf32>,
    return
  }
  func.func @transform_0(%arg0: i32) -> (i32, i32) {
    %c0_i32 = arith.constant 0 : i32
    %c0_i32_0 = arith.constant 0 : i32
    return %arg0, %c0_i32 : i32, i32
  }
  func.func @transform_1(%arg0: i32) -> (i32, i32) {
    %c0_i32 = arith.constant 0 : i32
    %c0_i32_0 = arith.constant 0 : i32
    %c0_i32_1 = arith.constant 0 : i32
    return %c0_i32, %c0_i32_0 : i32, i32
  }
  func.func @transform_2(%arg0: i32) -> (i32, i32) {
    %c0_i32 = arith.constant 0 : i32
    %c0_i32_0 = arith.constant 0 : i32
    %c0_i32_1 = arith.constant 0 : i32
    return %c0_i32, %c0_i32_0 : i32, i32
  }
  func.func @transform_3(%arg0: i32) -> (i32, i32) {
    %c0_i32 = arith.constant 0 : i32
    %c0_i32_0 = arith.constant 0 : i32
    return %arg0, %c0_i32 : i32, i32
  }
}

</mosaic_0001>

<bundles_post_ra>
// kernel: tpu_custom_call.1
= control target key start
LH: loop header
LB: loop body
LE: loop exit
PB: predicated region body
PF: predicated region fallthrough
CT: control target
= control target key end

     0   :  { %8 = vsyncpa [#allocation3], 0  ;;  %s2624_s0 = inlined_call_operand.hbm [shape: bf16[16,2048], index: 0, kind: input, shape index: {}]   ;;  %s2625_s1 = inlined_call_operand.hbm [shape: bf16[2048,128], index: 1, kind: input, shape index: {}]   ;;  %s2626_s2 = inlined_call_operand.vmem [shape: f32[1,128], index: 2, kind: input, shape index: {}]   ;;  %s2627_s3 = inlined_call_operand.hbm [shape: f32[16,128], index: 3, kind: output, shape index: {}]  }
   0x1   :  { %10 = vsyncpa [#allocation3 + $0x1], 0 }
   0x2   :  { %11 = vsyncpa [#allocation6], 0 }
   0x3   :  { %12 = vsyncpa [#allocation4], 0 }
   0x4   :  { %14 = vsyncpa [#allocation4 + $0x1], 0  ;;  %s2474_s12 = smov 0   ;;  %s2476_s13 = smov 0  }
   0x5   :  { %s2478_s14 = smov 0   ;;  %s2480_s15 = smov 0  }
   0x6 LB: > { %s130_s18 = sshll.u32 %s2625_s1, 4  ;;  %s2498_s19 = sadd.s32 4294967295, %s2449_s15   ;;  %s2449_s15 = sphi %s2480_s15, %s2637_s15   ;;  %s2445_s14 = sphi %s2478_s14, %s2636_s14   ;;  %s2441_s13 = sphi %s2476_s13, %s2635_s13   ;;  %s2437_s12 = sphi %s2474_s12, %s2634_s12   ;;  %s131_s18 = int_to_ptr.hbm [resolvable:$true] %s130_s18 }
   0x7   : > { %p1604_p0 = scmp.ge.s32.totalorder %s2449_s15, 1  ;;  %p41_p1 = scmp.eq.s32.totalorder %s2498_s19, 0 }
   0x8   : > { %p119_p2 = scmp.lt.s32.totalorder %s2449_s15, 3  ;;  %s2451_s21 = smov [#allocation5]  }
   0x9   : > { %s132_s22 = sshll.u32 %s2451_s21, 4  ;;  %s2452_s23 = smov 64   ;;  %s133_s22 = int_to_ptr.vmem [resolvable:$true] %s132_s22 }
   0xa   : > { %p2503_p3 = pnand %p1604_p0, %p119_p2  ;;  %s2453_s24 = smov 4  }
   0xb   : > { %s1603_s25 = sadd.s32 4294967294, %s2449_s15   ;;  %s2514_s26 = sadd.s32 1, %s2449_s15  }
   0xc   : > { %p2267_p4 = pneg %p2503_p3  ;;  %s27_s27 = sadd.s32 1, %s2445_s14 }
   0xd   : > { %s24_s28 = ssub.s32 %s2449_s15, %s2514_s26  ;;  %p34_p7 = scmp.ne.s32.totalorder %s2445_s14, %s2441_s13 }
   0xe   : > { %p2268_p6 = pnand %p2267_p4, %p41_p1  ;;  %p25_p8 = scmp.eq.s32.totalorder %s24_s28, 0 }
   0xf   : > { %p35_p9 = scmp.eq.s32.totalorder %s2449_s15, 0  ;;  %p40_p10 = scmp.ne.s32.totalorder %s2441_s13, %s2437_s12 }
  0x10   : > { %2270 = dma.hbm_to_vmem [thread:$0]  (!%p2268_p6), %s131_s18, 16384, %s133_s22, [#allocation6], %s2452_s23, %s2452_s23, %s2453_s24  }
  0x11   : > { %p106_p11 = scmp.eq.s32.totalorder %s2498_s19, 1  ;;  %p2530_p12 = por %p41_p1, %p40_p10 }
  0x12   : > { %s2526_s29 = scalar_select %p25_p8, %s2445_s14, %s27_s27  }
  0x13   : > { %p2534_p13 = por %p106_p11, %p34_p7  ;;  %p112_p0 = scmp.eq.s32.totalorder %s1603_s25, 1 }
  0x14   : > { %p36_p2 = por %p35_p9, %p34_p7  ;;  %s149_s5 = sand.u32 1, %s2445_s14  }
  0x15   : > { %p2539_p4 = por %p112_p0, %p40_p10  ;;  %p2280_p6 = scmp.lt.s32.totalorder %s2449_s15, 2 }
  0x16   : > { %s1607_s7 = sshll.u32 %s149_s5, 6  ;;  %s2130_s8 = sshll.u32 %s2449_s15, 6 }
  0x17   : > { %s158_s11 = scalar_lea.hbm %s2624_s0, %s2130_s8  ;;  %s153_s17 = scalar_lea.vmem [#allocation2], %s1607_s7 }
  0x18   : > { %s160_s16 = sshll.u32 %s158_s11, 4  ;;  %s162_s18 = sshll.u32 %s153_s17, 4  ;;  %s161_s16 = int_to_ptr.hbm [resolvable:$true] %s160_s16  ;;  %s163_s18 = int_to_ptr.vmem [resolvable:$true] %s162_s18 }
  0x19   : > { %p2548_p8 = pnand %p2280_p6, %p36_p2  ;;  %s150_s22 = scalar_lea.sflag [#allocation3], %s149_s5 }
  0x1a   : > { %s2349_s23 = sshra.s32 %s161_s16, 4  ;;  %s2356_s28 = scalar_lea.hbm %s2624_s0, 128  ;;  %s2350_s23 = int_to_ptr.hbm [resolvable:$true] %s2349_s23 }
  0x1b   : > { %s2351_s24 = scalar_lea.hbm %s2350_s23, 64  ;;  %p2353_p9 = pneg %p2548_p8 }
  0x1c   : > { %p2352_p7 = scmp.ne.s32.totalorder %s2350_s23, %s2351_s24  ;;  %p2357_p0 = scmp.lt.s32.totalorder %s2350_s23, %s2624_s0 }
  0x1d   : > { %p2358_p2 = scmp.lt.s32.totalorder %s2356_s28, %s2351_s24 }
  0x1e   : > { %p2354_p10 = pnand %p2353_p9, %p2352_p7 }
  0x1f   : > { %p2359_p6 = por %p2358_p2, %p2357_p0 }
  0x20   : > { %p2355_p11 = pneg %p2354_p10 }
  0x22   : > { %p2360_p5 = pnand %p2359_p6, %p2355_p11 }
  0x24   : > { %2363 = shalt.err (!%p2360_p5)
}
  0x25   : > { %2274 = dma.hbm_to_vmem [thread:$0]  (!%p2548_p8), %s161_s16, 1024, %s163_s18, %s150_s22  }
  0x26   : > { %171 = sbr.rel (%p2503_p3) target bundleno = 317 (0x13d), region = 32  ;;  %s2565_s5 = sand.u32 (!%p2503_p3), 1, %s2441_s13  }
  0x27   : > { %s1611_s9 = sshll.u32 (!%p2503_p3), %s2565_s5, 6  ;;  %s174_s10 = scalar_lea.sflag (!%p2503_p3), [#allocation3], %s2565_s5 }
  0x28   : > { %s2569_s11 = scalar_lea.vmem (!%p2503_p3), [#allocation2], %s1611_s9 }
  0x2b   : > { %2424 = dma.done.wait (%p2530_p12), %s174_s10, 1024  }
  0x2c   : > { %2426 = vsyncadd (%p2530_p12), %s174_s10, 4294966272 }
  0x2d   : > { %2428 = dma.done.wait (%p41_p1), [#allocation6], 16384  }
  0x2e   : > { %2430 = vsyncadd (%p41_p1), [#allocation6], 4294950912  ;;  %v2138_v0 = vld [vmem:[#allocation5 + $0x38] sm:$0xff]  ;;  %v2137_v4 = vld [vmem:[#allocation5 + $0x30] sm:$0xff]  ;;  %s1613_s16 = sshll.u32 %s2565_s5, 3  ;;  %s2127_s17 = sshll.u32 %s2498_s19, 3 }
  0x2f   : > { %v2146_v1 = vld [vmem:[#allocation5 + $0x78] sm:$0xff]  ;;  %1298 = vmatpush.bf16.msra.mxu0 %v2138_v0  ;;  %v2145_v5 = vld [vmem:[#allocation5 + $0x70] sm:$0xff]  ;;  %v2136_v8 = vld [vmem:[#allocation5 + $0x28] sm:$0xff]  ;;  %s1518_s22 = scalar_lea.hbm %s2627_s3, %s2127_s17  ;;  %s205_s23 = scalar_lea.vmem [#allocation7], %s1613_s16 }
  0x30   : > { %v2154_v2 = vld [vmem:[#allocation5 + $0xb8] sm:$0xff]  ;;  %1311 = vmatpush.bf16.msra.mxu1 %v2146_v1  ;;  %v2153_v6 = vld [vmem:[#allocation5 + $0xb0] sm:$0xff]  ;;  %v2144_v9 = vld [vmem:[#allocation5 + $0x68] sm:$0xff]  ;;  %s1520_s24 = sshll.u32 %s205_s23, 4  ;;  %s1522_s25 = sshll.u32 %s1518_s22, 4  ;;  %s1521_s24 = int_to_ptr.vmem [resolvable:$true] %s1520_s24  ;;  %s1523_s25 = int_to_ptr.hbm [resolvable:$true] %s1522_s25 }
  0x31   : > { %v2162_v3 = vld [vmem:[#allocation5 + $0xf8] sm:$0xff]  ;;  %1324 = vmatpush.bf16.msra.mxu2 %v2154_v2  ;;  %v2161_v7 = vld [vmem:[#allocation5 + $0xf0] sm:$0xff]  ;;  %v2152_v10 = vld [vmem:[#allocation5 + $0xa8] sm:$0xff]  ;;  %s1508_s19 = scalar_lea.sflag [#allocation4], %s2565_s5  ;;  %s2393_s27 = sshra.s32 %s1523_s25, 4  ;;  %s2394_s27 = int_to_ptr.hbm [resolvable:$true] %s2393_s27 }
  0x32   : > { %1337 = vmatpush.bf16.msra.mxu3 %v2162_v3  ;;  %v2160_v11 = vld [vmem:[#allocation5 + $0xe8] sm:$0xff]  ;;  %v2135_v12 = vld [vmem:[#allocation5 + $0x20] sm:$0xff]  ;;  %v2134_v16 = vld [vmem:[#allocation5 + $0x18] sm:$0xff]  ;;  %s2395_s28 = scalar_lea.hbm %s2394_s27, 8  ;;  %s2399_s9 = scalar_lea.hbm %s2627_s3, 16 }
  0x33   : > { %1299 = vmatpush.bf16.msra.mxu0 %v2137_v4  ;;  %v2143_v13 = vld [vmem:[#allocation5 + $0x60] sm:$0xff]  ;;  %v2142_v17 = vld [vmem:[#allocation5 + $0x58] sm:$0xff]  ;;  %v2133_v20 = vld [vmem:[#allocation5 + $0x10] sm:$0xff]  ;;  %p2396_p1 = scmp.ne.s32.totalorder %s2394_s27, %s2395_s28  ;;  %p2400_p12 = scmp.lt.s32.totalorder %s2394_s27, %s2627_s3 }
  0x34   : > { %1312 = vmatpush.bf16.msra.mxu1 %v2145_v5  ;;  %v2151_v14 = vld [vmem:[#allocation5 + $0xa0] sm:$0xff]  ;;  %v2150_v18 = vld [vmem:[#allocation5 + $0x98] sm:$0xff]  ;;  %v2141_v21 = vld [vmem:[#allocation5 + $0x50] sm:$0xff]  ;;  %p2401_p8 = scmp.lt.s32.totalorder %s2399_s9, %s2395_s28 }
  0x35   : > { %1325 = vmatpush.bf16.msra.mxu2 %v2153_v6  ;;  %v2159_v15 = vld [vmem:[#allocation5 + $0xe0] sm:$0xff]  ;;  %v2158_v19 = vld [vmem:[#allocation5 + $0xd8] sm:$0xff]  ;;  %v2149_v22 = vld [vmem:[#allocation5 + $0x90] sm:$0xff]  ;;  %p2397_p3 = pnand %p2396_p1, %p2534_p13 }
  0x36   : > { %1338 = vmatpush.bf16.msra.mxu3 %v2161_v7  ;;  %v2157_v23 = vld [vmem:[#allocation5 + $0xd0] sm:$0xff]  ;;  %v2132_v24 = vld [vmem:[#allocation5 + $0x8] sm:$0xff]  ;;  %v206_v29 = vld [vmem:[%s2569_s11] sm:$0xff]  ;;  %p2402_p7 = por %p2401_p8, %p2400_p12 }
  0x37   : > { %1300 = vmatpush.bf16.msra.mxu0 %v2136_v8  ;;  %v2140_v25 = vld [vmem:[#allocation5 + $0x48] sm:$0xff]  ;;  %v2131_v30 = vld [vmem:[#allocation5] sm:$0xff]  ;;  %v482_v33 = vunpack.c.l.b16 %v206_v29  ;;  %v483_v37 = vunpack.c.h.b16 %v206_v29  ;;  %v2170_v38 = vld [vmem:[#allocation5 + $0x138] sm:$0xff]  ;;  %p2398_p5 = pneg %p2397_p3 }
  0x38   : > { %1313 = vmatpush.bf16.msra.mxu1 %v2144_v9  ;;  %v2148_v26 = vld [vmem:[#allocation5 + $0x88] sm:$0xff]  ;;  %v2139_v31 = vld [vmem:[#allocation5 + $0x40] sm:$0xff]  ;;  %v2178_v39 = vld [vmem:[#allocation5 + $0x178] sm:$0xff] }
  0x39   : > { %1326 = vmatpush.bf16.msra.mxu2 %v2152_v10  ;;  %v2156_v27 = vld [vmem:[#allocation5 + $0xc8] sm:$0xff]  ;;  %v2147_v34 = vld [vmem:[#allocation5 + $0x80] sm:$0xff]  ;;  %v2186_v40 = vld [vmem:[#allocation5 + $0x1b8] sm:$0xff]  ;;  %v498_v43 = vpack.c.b16 %v482_v33, %v482_v33  ;;  %v499_v45 = vpack.c.b16 %v483_v37, %v483_v37  ;;  %p2403_p9 = pnand %p2402_p7, %p2398_p5 }
  0x3a   : > { %1339 = vmatpush.bf16.msra.mxu3 %v2160_v11  ;;  %v207_v28 = vld [vmem:[%s2569_s11 + $0x8] sm:$0xff]  ;;  %v2155_v35 = vld [vmem:[#allocation5 + $0xc0] sm:$0xff]  ;;  %v2194_v41 = vld [vmem:[#allocation5 + $0x1f8] sm:$0xff] }
  0x3b   : > { %1301 = vmatpush.bf16.msra.mxu0 %v2135_v12  ;;  %v484_v32 = vunpack.c.l.b16 %v207_v28  ;;  %v485_v36 = vunpack.c.h.b16 %v207_v28  ;;  %v2169_v46 = vld [vmem:[#allocation5 + $0x130] sm:$0xff]  ;;  %v2168_v50 = vld [vmem:[#allocation5 + $0x128] sm:$0xff]  ;;  %v2167_v54 = vld [vmem:[#allocation5 + $0x120] sm:$0xff] }
  0x3c   : > { %1314 = vmatpush.bf16.msra.mxu1 %v2143_v13  ;;  %v2177_v47 = vld [vmem:[#allocation5 + $0x170] sm:$0xff]  ;;  %v2176_v51 = vld [vmem:[#allocation5 + $0x168] sm:$0xff]  ;;  %v2175_v55 = vld [vmem:[#allocation5 + $0x160] sm:$0xff] }
  0x3d   : > { %1327 = vmatpush.bf16.msra.mxu2 %v2151_v14  ;;  %v500_v42 = vpack.c.b16 %v484_v32, %v484_v32  ;;  %v501_v44 = vpack.c.b16 %v485_v36, %v485_v36  ;;  %v2185_v48 = vld [vmem:[#allocation5 + $0x1b0] sm:$0xff]  ;;  %v2184_v52 = vld [vmem:[#allocation5 + $0x1a8] sm:$0xff]  ;;  %v2183_v56 = vld [vmem:[#allocation5 + $0x1a0] sm:$0xff] }
  0x3e   : > { %1340 = vmatpush.bf16.msra.mxu3 %v2159_v15  ;;  %v2193_v49 = vld [vmem:[#allocation5 + $0x1f0] sm:$0xff]  ;;  %v2192_v53 = vld [vmem:[#allocation5 + $0x1e8] sm:$0xff]  ;;  %v2191_v57 = vld [vmem:[#allocation5 + $0x1e0] sm:$0xff] }
  0x3f   : > { %1302 = vmatpush.bf16.msra.mxu0 %v2134_v16  ;;  %v2166_v58 = vld [vmem:[#allocation5 + $0x118] sm:$0xff]  ;;  %v2165_v62 = vld [vmem:[#allocation5 + $0x110] sm:$0xff]  ;;  %v2164_v2 = vld [vmem:[#allocation5 + $0x108] sm:$0xff] }
  0x40   : > { %1315 = vmatpush.bf16.msra.mxu1 %v2142_v17  ;;  %v2174_v59 = vld [vmem:[#allocation5 + $0x158] sm:$0xff]  ;;  %v2173_v63 = vld [vmem:[#allocation5 + $0x150] sm:$0xff]  ;;  %v2172_v3 = vld [vmem:[#allocation5 + $0x148] sm:$0xff] }
  0x41   : > { %1328 = vmatpush.bf16.msra.mxu2 %v2150_v18  ;;  %v2182_v60 = vld [vmem:[#allocation5 + $0x198] sm:$0xff]  ;;  %v2181_v0 = vld [vmem:[#allocation5 + $0x190] sm:$0xff]  ;;  %v2180_v4 = vld [vmem:[#allocation5 + $0x188] sm:$0xff] }
  0x42   : > { %1341 = vmatpush.bf16.msra.mxu3 %v2158_v19  ;;  %v2190_v61 = vld [vmem:[#allocation5 + $0x1d8] sm:$0xff]  ;;  %v2189_v1 = vld [vmem:[#allocation5 + $0x1d0] sm:$0xff]  ;;  %v2188_v5 = vld [vmem:[#allocation5 + $0x1c8] sm:$0xff] }
  0x43   : > { %1303 = vmatpush.bf16.msra.mxu0 %v2133_v20  ;;  %v209_v6 = vld [vmem:[%s2569_s11 + $0x18] sm:$0xff]  ;;  %v208_v7 = vld [vmem:[%s2569_s11 + $0x10] sm:$0xff]  ;;  %v2163_v8 = vld [vmem:[#allocation5 + $0x100] sm:$0xff] }
  0x44   : > { %1316 = vmatpush.bf16.msra.mxu1 %v2141_v21  ;;  %v2171_v9 = vld [vmem:[#allocation5 + $0x140] sm:$0xff]  ;;  %v488_v10 = vunpack.c.l.b16 %v209_v6  ;;  %v486_v11 = vunpack.c.l.b16 %v208_v7  ;;  %v489_v14 = vunpack.c.h.b16 %v209_v6  ;;  %v487_v15 = vunpack.c.h.b16 %v208_v7  ;;  %v2202_v16 = vld [vmem:[#allocation5 + $0x238] sm:$0xff]  ;;  %v2200_v28 = vld [vmem:[#allocation5 + $0x228] sm:$0xff] }
  0x45   : > { %1329 = vmatpush.bf16.msra.mxu2 %v2149_v22  ;;  %v2179_v12 = vld [vmem:[#allocation5 + $0x180] sm:$0xff]  ;;  %v2210_v17 = vld [vmem:[#allocation5 + $0x278] sm:$0xff]  ;;  %v2208_v29 = vld [vmem:[#allocation5 + $0x268] sm:$0xff] }
  0x46   : > { %1342 = vmatpush.bf16.msra.mxu3 %v2157_v23  ;;  %v2187_v13 = vld [vmem:[#allocation5 + $0x1c0] sm:$0xff]  ;;  %v2218_v18 = vld [vmem:[#allocation5 + $0x2b8] sm:$0xff]  ;;  %v504_v20 = vpack.c.b16 %v488_v10, %v488_v10  ;;  %v502_v21 = vpack.c.b16 %v486_v11, %v486_v11  ;;  %v505_v22 = vpack.c.b16 %v489_v14, %v489_v14  ;;  %v503_v23 = vpack.c.b16 %v487_v15, %v487_v15  ;;  %v2232_v6 = vld [vmem:[#allocation5 + $0x328] sm:$0xff] }
  0x47   : > { %1304 = vmatpush.bf16.msra.mxu0 %v2132_v24  ;;  %v2226_v19 = vld [vmem:[#allocation5 + $0x2f8] sm:$0xff]  ;;  %v2201_v24 = vld [vmem:[#allocation5 + $0x230] sm:$0xff]  ;;  %v2199_v32 = vld [vmem:[#allocation5 + $0x220] sm:$0xff] }
  0x48   : > { %1317 = vmatpush.bf16.msra.mxu1 %v2140_v25  ;;  %v2209_v25 = vld [vmem:[#allocation5 + $0x270] sm:$0xff]  ;;  %v2207_v33 = vld [vmem:[#allocation5 + $0x260] sm:$0xff]  ;;  %v2198_v36 = vld [vmem:[#allocation5 + $0x218] sm:$0xff] }
  0x49   : > { %1330 = vmatpush.bf16.msra.mxu2 %v2148_v26  ;;  %v2217_v26 = vld [vmem:[#allocation5 + $0x2b0] sm:$0xff]  ;;  %v2206_v37 = vld [vmem:[#allocation5 + $0x258] sm:$0xff]  ;;  %v2240_v7 = vld [vmem:[#allocation5 + $0x368] sm:$0xff] }
  0x4a   : > { %1343 = vmatpush.bf16.msra.mxu3 %v2156_v27  ;;  %v2225_v27 = vld [vmem:[#allocation5 + $0x2f0] sm:$0xff]  ;;  %v2231_v10 = vld [vmem:[#allocation5 + $0x320] sm:$0xff]  ;;  %v2230_v14 = vld [vmem:[#allocation5 + $0x318] sm:$0xff] }
  0x4b   : > { %1305 = vmatpush.bf16.msra.mxu0 %v2131_v30  ;;  %v2216_v30 = vld [vmem:[#allocation5 + $0x2a8] sm:$0xff]  ;;  %v2239_v11 = vld [vmem:[#allocation5 + $0x360] sm:$0xff]  ;;  %v2238_v15 = vld [vmem:[#allocation5 + $0x358] sm:$0xff] }
  0x4c   : > { %1318 = vmatpush.bf16.msra.mxu1 %v2139_v31  ;;  %v2224_v31 = vld [vmem:[#allocation5 + $0x2e8] sm:$0xff] }
  0x4d   : > { %1331 = vmatpush.bf16.msra.mxu2 %v2147_v34  ;;  %v2215_v34 = vld [vmem:[#allocation5 + $0x2a0] sm:$0xff] }
  0x4e   : > { %1344 = vmatpush.bf16.msra.mxu3 %v2155_v35  ;;  %1306 = vmatmul.bf16.vlgmr.msra.gmra.mxu0 %v498_v43  ;;  %v2223_v35 = vld [vmem:[#allocation5 + $0x2e0] sm:$0xff]  ;;  %v2221_v43 = vld [vmem:[#allocation5 + $0x2d0] sm:$0xff] }
  0x4f   : > { %1350 = vmatpush.bf16.msrb.mxu0 %v2170_v38  ;;  %1319 = vmatmul.bf16.vlgmr.msra.gmra.mxu1 %v499_v45  ;;  %v2214_v38 = vld [vmem:[#allocation5 + $0x298] sm:$0xff]  ;;  %v2204_v45 = vld [vmem:[#allocation5 + $0x248] sm:$0xff] }
  0x50   : > { %1363 = vmatpush.bf16.msrb.mxu1 %v2178_v39  ;;  %1332 = vmatmul.bf16.vlgmr.msra.gmra.mxu2 %v500_v42  ;;  %v2222_v39 = vld [vmem:[#allocation5 + $0x2d8] sm:$0xff]  ;;  %v2213_v42 = vld [vmem:[#allocation5 + $0x290] sm:$0xff] }
  0x51   : > { %1376 = vmatpush.bf16.msrb.mxu2 %v2186_v40  ;;  %1345 = vmatmul.bf16.vlgmr.msra.gmra.mxu3 %v501_v44  ;;  %v2197_v40 = vld [vmem:[#allocation5 + $0x210] sm:$0xff]  ;;  %v2196_v44 = vld [vmem:[#allocation5 + $0x208] sm:$0xff] }
  0x52   : > { %1389 = vmatpush.bf16.msrb.mxu3 %v2194_v41  ;;  %v2205_v41 = vld [vmem:[#allocation5 + $0x250] sm:$0xff] }
  0x53   : > { %1351 = vmatpush.bf16.msrb.mxu0 %v2169_v46  ;;  %v2212_v46 = vld [vmem:[#allocation5 + $0x288] sm:$0xff] }
  0x54   : > { %1364 = vmatpush.bf16.msrb.mxu1 %v2177_v47  ;;  %v2220_v47 = vld [vmem:[#allocation5 + $0x2c8] sm:$0xff] }
  0x55   : > { %1377 = vmatpush.bf16.msrb.mxu2 %v2185_v48  ;;  %v210_v48 = vld [vmem:[%s2569_s11 + $0x20] sm:$0xff] }
  0x56   : > { %1390 = vmatpush.bf16.msrb.mxu3 %v2193_v49  ;;  %v211_v49 = vld [vmem:[%s2569_s11 + $0x28] sm:$0xff] }
  0x57   : > { %1352 = vmatpush.bf16.msrb.mxu0 %v2168_v50  ;;  %v2195_v50 = vld [vmem:[#allocation5 + $0x200] sm:$0xff] }
  0x58   : > { %1365 = vmatpush.bf16.msrb.mxu1 %v2176_v51  ;;  %v2203_v51 = vld [vmem:[#allocation5 + $0x240] sm:$0xff] }
  0x59   : > { %1378 = vmatpush.bf16.msrb.mxu2 %v2184_v52  ;;  %v490_v52 = vunpack.c.l.b16 %v210_v48 }
  0x5a   : > { %1391 = vmatpush.bf16.msrb.mxu3 %v2192_v53  ;;  %v492_v53 = vunpack.c.l.b16 %v211_v49 }
  0x5b   : > { %1353 = vmatpush.bf16.msrb.mxu0 %v2167_v54  ;;  %v2211_v54 = vld [vmem:[#allocation5 + $0x280] sm:$0xff] }
  0x5c   : > { %1366 = vmatpush.bf16.msrb.mxu1 %v2175_v55  ;;  %v2219_v55 = vld [vmem:[#allocation5 + $0x2c0] sm:$0xff] }
  0x5d   : > { %1379 = vmatpush.bf16.msrb.mxu2 %v2183_v56  ;;  %v491_v56 = vunpack.c.h.b16 %v210_v48 }
  0x5e   : > { %1392 = vmatpush.bf16.msrb.mxu3 %v2191_v57  ;;  %v493_v57 = vunpack.c.h.b16 %v211_v49 }
  0x5f   : > { %1354 = vmatpush.bf16.msrb.mxu0 %v2166_v58  ;;  %v2234_v58 = vld [vmem:[#allocation5 + $0x338] sm:$0xff] }
  0x60   : > { %1367 = vmatpush.bf16.msrb.mxu1 %v2174_v59  ;;  %v2242_v59 = vld [vmem:[#allocation5 + $0x378] sm:$0xff] }
  0x61   : > { %1380 = vmatpush.bf16.msrb.mxu2 %v2182_v60  ;;  %v2250_v60 = vld [vmem:[#allocation5 + $0x3b8] sm:$0xff] }
  0x62   : > { %1393 = vmatpush.bf16.msrb.mxu3 %v2190_v61  ;;  %v2258_v61 = vld [vmem:[#allocation5 + $0x3f8] sm:$0xff] }
  0x63   : > { %1355 = vmatpush.bf16.msrb.mxu0 %v2165_v62  ;;  %v506_v62 = vpack.c.b16 %v490_v52, %v490_v52 }
  0x64   : > { %1368 = vmatpush.bf16.msrb.mxu1 %v2173_v63  ;;  %v508_v63 = vpack.c.b16 %v492_v53, %v492_v53 }
  0x65   : > { %1381 = vmatpush.bf16.msrb.mxu2 %v2181_v0  ;;  %v507_v0 = vpack.c.b16 %v491_v56, %v491_v56 }
  0x66   : > { %1394 = vmatpush.bf16.msrb.mxu3 %v2189_v1  ;;  %v509_v1 = vpack.c.b16 %v493_v57, %v493_v57 }
  0x67   : > { %1356 = vmatpush.bf16.msrb.mxu0 %v2164_v2  ;;  %v2233_v2 = vld [vmem:[#allocation5 + $0x330] sm:$0xff] }
  0x68   : > { %1369 = vmatpush.bf16.msrb.mxu1 %v2172_v3  ;;  %v2241_v3 = vld [vmem:[#allocation5 + $0x370] sm:$0xff] }
  0x69   : > { %1382 = vmatpush.bf16.msrb.mxu2 %v2180_v4  ;;  %v2249_v4 = vld [vmem:[#allocation5 + $0x3b0] sm:$0xff] }
  0x6a   : > { %1395 = vmatpush.bf16.msrb.mxu3 %v2188_v5  ;;  %v2257_v5 = vld [vmem:[#allocation5 + $0x3f0] sm:$0xff] }
  0x6b   : > { %1357 = vmatpush.bf16.msrb.mxu0 %v2163_v8  ;;  %v2248_v8 = vld [vmem:[#allocation5 + $0x3a8] sm:$0xff] }
  0x6c   : > { %1370 = vmatpush.bf16.msrb.mxu1 %v2171_v9  ;;  %v2256_v9 = vld [vmem:[#allocation5 + $0x3e8] sm:$0xff] }
  0x6d   : > { %1383 = vmatpush.bf16.msrb.mxu2 %v2179_v12  ;;  %v2247_v12 = vld [vmem:[#allocation5 + $0x3a0] sm:$0xff] }
  0x6e   : > { %1396 = vmatpush.bf16.msrb.mxu3 %v2187_v13  ;;  %1358 = vmatmul.bf16.vlgmr.msrb.gmra.mxu0 %v502_v21  ;;  %v2255_v13 = vld [vmem:[#allocation5 + $0x3e0] sm:$0xff]  ;;  %v2253_v21 = vld [vmem:[#allocation5 + $0x3d0] sm:$0xff] }
  0x6f   : > { %1402 = vmatpush.bf16.msra.mxu0 %v2202_v16  ;;  %1371 = vmatmul.bf16.vlgmr.msrb.gmra.mxu1 %v503_v23  ;;  %v2246_v16 = vld [vmem:[#allocation5 + $0x398] sm:$0xff]  ;;  %v2236_v23 = vld [vmem:[#allocation5 + $0x348] sm:$0xff] }
  0x70   : > { %1415 = vmatpush.bf16.msra.mxu1 %v2210_v17  ;;  %1384 = vmatmul.bf16.vlgmr.msrb.gmra.mxu2 %v504_v20  ;;  %v2254_v17 = vld [vmem:[#allocation5 + $0x3d8] sm:$0xff]  ;;  %v2245_v20 = vld [vmem:[#allocation5 + $0x390] sm:$0xff] }
  0x71   : > { %1428 = vmatpush.bf16.msra.mxu2 %v2218_v18  ;;  %1397 = vmatmul.bf16.vlgmr.msrb.gmra.mxu3 %v505_v22  ;;  %v2229_v18 = vld [vmem:[#allocation5 + $0x310] sm:$0xff]  ;;  %v2228_v22 = vld [vmem:[#allocation5 + $0x308] sm:$0xff] }
  0x72   : > { %1441 = vmatpush.bf16.msra.mxu3 %v2226_v19  ;;  %v2237_v19 = vld [vmem:[#allocation5 + $0x350] sm:$0xff] }
  0x73   : > { %1403 = vmatpush.bf16.msra.mxu0 %v2201_v24  ;;  %v212_v24 = vld [vmem:[%s2569_s11 + $0x30] sm:$0xff] }
  0x74   : > { %1416 = vmatpush.bf16.msra.mxu1 %v2209_v25  ;;  %v2244_v25 = vld [vmem:[#allocation5 + $0x388] sm:$0xff] }
  0x75   : > { %1429 = vmatpush.bf16.msra.mxu2 %v2217_v26  ;;  %v2252_v26 = vld [vmem:[#allocation5 + $0x3c8] sm:$0xff] }
  0x76   : > { %1442 = vmatpush.bf16.msra.mxu3 %v2225_v27  ;;  %v213_v27 = vld [vmem:[%s2569_s11 + $0x38] sm:$0xff] }
  0x77   : > { %1404 = vmatpush.bf16.msra.mxu0 %v2200_v28  ;;  %v494_v28 = vunpack.c.l.b16 %v212_v24 }
  0x78   : > { %1417 = vmatpush.bf16.msra.mxu1 %v2208_v29  ;;  %v495_v29 = vunpack.c.h.b16 %v212_v24 }
  0x79   : > { %1430 = vmatpush.bf16.msra.mxu2 %v2216_v30  ;;  %v2227_v30 = vld [vmem:[#allocation5 + $0x300] sm:$0xff] }
  0x7a   : > { %1443 = vmatpush.bf16.msra.mxu3 %v2224_v31  ;;  %v2235_v31 = vld [vmem:[#allocation5 + $0x340] sm:$0xff] }
  0x7b   : > { %1405 = vmatpush.bf16.msra.mxu0 %v2199_v32  ;;  %v496_v32 = vunpack.c.l.b16 %v213_v27 }
  0x7c   : > { %1418 = vmatpush.bf16.msra.mxu1 %v2207_v33  ;;  %v497_v33 = vunpack.c.h.b16 %v213_v27 }
  0x7d   : > { %1431 = vmatpush.bf16.msra.mxu2 %v2215_v34  ;;  %v2243_v34 = vld [vmem:[#allocation5 + $0x380] sm:$0xff] }
  0x7e   : > { %1444 = vmatpush.bf16.msra.mxu3 %v2223_v35  ;;  %v2251_v35 = vld [vmem:[#allocation5 + $0x3c0] sm:$0xff] }
  0x7f   : > { %1406 = vmatpush.bf16.msra.mxu0 %v2198_v36  ;;  %v510_v36 = vpack.c.b16 %v494_v28, %v494_v28 }
  0x80   : > { %1419 = vmatpush.bf16.msra.mxu1 %v2206_v37  ;;  %v511_v37 = vpack.c.b16 %v495_v29, %v495_v29 }
  0x81   : > { %1432 = vmatpush.bf16.msra.mxu2 %v2214_v38  ;;  %v512_v38 = vpack.c.b16 %v496_v32, %v496_v32 }
  0x82   : > { %1445 = vmatpush.bf16.msra.mxu3 %v2222_v39  ;;  %v513_v39 = vpack.c.b16 %v497_v33, %v497_v33 }
  0x83   : > { %1407 = vmatpush.bf16.msra.mxu0 %v2197_v40  ;;  %v2318_v40 = vld [vmem:[%s2626_s2] ss:$0 sm:$0xff] }
  0x84   : > { %1420 = vmatpush.bf16.msra.mxu1 %v2205_v41 }
  0x85   : > { %1433 = vmatpush.bf16.msra.mxu2 %v2213_v42 }
  0x86   : > { %1446 = vmatpush.bf16.msra.mxu3 %v2221_v43 }
  0x87   : > { %1408 = vmatpush.bf16.msra.mxu0 %v2196_v44 }
  0x88   : > { %1421 = vmatpush.bf16.msra.mxu1 %v2204_v45 }
  0x89   : > { %1434 = vmatpush.bf16.msra.mxu2 %v2212_v46 }
  0x8a   : > { %1447 = vmatpush.bf16.msra.mxu3 %v2220_v47 }
  0x8b   : > { %1409 = vmatpush.bf16.msra.mxu0 %v2195_v50 }
  0x8c   : > { %1422 = vmatpush.bf16.msra.mxu1 %v2203_v51 }
  0x8d   : > { %1435 = vmatpush.bf16.msra.mxu2 %v2211_v54 }
  0x8e   : > { %1448 = vmatpush.bf16.msra.mxu3 %v2219_v55  ;;  %1410 = vmatmul.bf16.vlgmr.msra.gmra.mxu0 %v506_v62 }
  0x8f   : > { %1454 = vmatpush.bf16.msrb.mxu0 %v2234_v58  ;;  %1423 = vmatmul.bf16.vlgmr.msra.gmra.mxu1 %v507_v0 }
  0x90   : > { %1467 = vmatpush.bf16.msrb.mxu1 %v2242_v59  ;;  %1436 = vmatmul.bf16.vlgmr.msra.gmra.mxu2 %v508_v63 }
  0x91   : > { %1480 = vmatpush.bf16.msrb.mxu2 %v2250_v60  ;;  %1449 = vmatmul.bf16.vlgmr.msra.gmra.mxu3 %v509_v1 }
  0x92   : > { %1493 = vmatpush.bf16.msrb.mxu3 %v2258_v61 }
  0x93   : > { %1455 = vmatpush.bf16.msrb.mxu0 %v2233_v2 }
  0x94   : > { %1468 = vmatpush.bf16.msrb.mxu1 %v2241_v3 }
  0x95   : > { %1481 = vmatpush.bf16.msrb.mxu2 %v2249_v4 }
  0x96   : > { %1494 = vmatpush.bf16.msrb.mxu3 %v2257_v5 }
  0x97   : > { %1456 = vmatpush.bf16.msrb.mxu0 %v2232_v6 }
  0x98   : > { %1469 = vmatpush.bf16.msrb.mxu1 %v2240_v7 }
  0x99   : > { %1482 = vmatpush.bf16.msrb.mxu2 %v2248_v8 }
  0x9a   : > { %1495 = vmatpush.bf16.msrb.mxu3 %v2256_v9 }
  0x9b   : > { %1457 = vmatpush.bf16.msrb.mxu0 %v2231_v10 }
  0x9c   : > { %1470 = vmatpush.bf16.msrb.mxu1 %v2239_v11 }
  0x9d   : > { %1483 = vmatpush.bf16.msrb.mxu2 %v2247_v12 }
  0x9e   : > { %1496 = vmatpush.bf16.msrb.mxu3 %v2255_v13 }
  0x9f   : > { %1458 = vmatpush.bf16.msrb.mxu0 %v2230_v14 }
  0xa0   : > { %1471 = vmatpush.bf16.msrb.mxu1 %v2238_v15 }
  0xa1   : > { %1484 = vmatpush.bf16.msrb.mxu2 %v2246_v16 }
  0xa2   : > { %1497 = vmatpush.bf16.msrb.mxu3 %v2254_v17 }
  0xa3   : > { %1459 = vmatpush.bf16.msrb.mxu0 %v2229_v18 }
  0xa4   : > { %1472 = vmatpush.bf16.msrb.mxu1 %v2237_v19 }
  0xa5   : > { %1485 = vmatpush.bf16.msrb.mxu2 %v2245_v20 }
  0xa6   : > { %1498 = vmatpush.bf16.msrb.mxu3 %v2253_v21 }
  0xa7   : > { %1460 = vmatpush.bf16.msrb.mxu0 %v2228_v22 }
  0xa8   : > { %1473 = vmatpush.bf16.msrb.mxu1 %v2236_v23 }
  0xa9   : > { %1486 = vmatpush.bf16.msrb.mxu2 %v2244_v25 }
  0xaa   : > { %1499 = vmatpush.bf16.msrb.mxu3 %v2252_v26 }
  0xab   : > { %1461 = vmatpush.bf16.msrb.mxu0 %v2227_v30 }
  0xac   : > { %1474 = vmatpush.bf16.msrb.mxu1 %v2235_v31 }
  0xad   : > { %1487 = vmatpush.bf16.msrb.mxu2 %v2243_v34 }
  0xae   : > { %1500 = vmatpush.bf16.msrb.mxu3 %v2251_v35  ;;  %1462 = vmatmul.bf16.vlgmr.msrb.gmra.mxu0 %v510_v36 }
  0xaf   : > { %1475 = vmatmul.bf16.vlgmr.msrb.gmra.mxu1 %v511_v37 }
  0xb0   : > { %1488 = vmatmul.bf16.vlgmr.msrb.gmra.mxu2 %v512_v38 }
  0xb1   : > { %1501 = vmatmul.bf16.vlgmr.msrb.gmra.mxu3 %v513_v39 }
  0xcb   : > { %v1307_v41 = vpop.f32.mrf.mxu0 }
  0xcc   : > { %v1308_v42 = vadd.f32 %v2318_v40, %v1307_v41  ;;  %v1320_v43 = vpop.f32.mrf.mxu1 }
  0xce   : > { %v1321_v44 = vadd.f32 %v1320_v43, %v1308_v42 }
  0xd3   : > { %v1333_v45 = vpop.f32.mrf.mxu2  ;;  %v1309_v48 = vpop.f32.mrf.mxu0 }
  0xd4   : > { %v1334_v46 = vadd.f32 %v1333_v45, %v1321_v44  ;;  %v1346_v47 = vpop.f32.mrf.mxu3  ;;  %v1322_v50 = vpop.f32.mrf.mxu1 }
  0xd6   : > { %v1347_v49 = vadd.f32 %v1346_v47, %v1334_v46 }
  0xdb   : > { %v1335_v51 = vpop.f32.mrf.mxu2 }
  0xdc   : > { %v1348_v52 = vpop.f32.mrf.mxu3 }
  0xeb   : > { %v1359_v53 = vpop.f32.mrf.mxu0 }
  0xec   : > { %v1372_v54 = vpop.f32.mrf.mxu1  ;;  %v1360_v63 = vadd.f32 %v1359_v53, %v1347_v49 }
  0xee   : > { %v1373_v3 = vadd.f32 %v1372_v54, %v1360_v63 }
  0xf3   : > { %v1385_v55 = vpop.f32.mrf.mxu2  ;;  %v1361_v57 = vpop.f32.mrf.mxu0 }
  0xf4   : > { %v1398_v56 = vpop.f32.mrf.mxu3  ;;  %v1374_v58 = vpop.f32.mrf.mxu1  ;;  %v1386_v5 = vadd.f32 %v1385_v55, %v1373_v3 }
  0xf6   : > { %v1399_v8 = vadd.f32 %v1398_v56, %v1386_v5 }
  0xfb   : > { %v1387_v59 = vpop.f32.mrf.mxu2 }
  0xfc   : > { %v1400_v60 = vpop.f32.mrf.mxu3 }
 0x10b   : > { %v1411_v61 = vpop.f32.mrf.mxu0 }
 0x10c   : > { %v1424_v62 = vpop.f32.mrf.mxu1  ;;  %v1412_v9 = vadd.f32 %v1411_v61, %v1399_v8 }
 0x10e   : > { %v1425_v10 = vadd.f32 %v1424_v62, %v1412_v9 }
 0x113   : > { %v1437_v0 = vpop.f32.mrf.mxu2  ;;  %v1413_v2 = vpop.f32.mrf.mxu0 }
 0x114   : > { %v1450_v1 = vpop.f32.mrf.mxu3  ;;  %v1426_v4 = vpop.f32.mrf.mxu1  ;;  %v1438_v11 = vadd.f32 %v1437_v0, %v1425_v10 }
 0x116   : > { %v1451_v12 = vadd.f32 %v1450_v1, %v1438_v11 }
 0x11b   : > { %v1439_v6 = vpop.f32.mrf.mxu2 }
 0x11c   : > { %v1452_v7 = vpop.f32.mrf.mxu3 }
 0x12b   : > { %v1463_v13 = vpop.f32.mrf.mxu0 }
 0x12c   : > { %v1476_v14 = vpop.f32.mrf.mxu1  ;;  %v1464_v15 = vadd.f32 %v1463_v13, %v1451_v12 }
 0x12e   : > { %v1477_v16 = vadd.f32 %v1476_v14, %v1464_v15 }
 0x133   : > { %v1489_v17 = vpop.f32.mrf.mxu2  ;;  %v1465_v20 = vpop.f32.mrf.mxu0 }
 0x134   : > { %v1502_v18 = vpop.f32.mrf.mxu3  ;;  %v1490_v19 = vadd.f32 %v1489_v17, %v1477_v16  ;;  %v1478_v21 = vpop.f32.mrf.mxu1 }
 0x136   : > { %v1503_v22 = vadd.f32 %v1502_v18, %v1490_v19 }
 0x138   : > { %1506 = vst [vmem:[%s205_s23] sm:$0xff] %v1503_v22 }
 0x139   : > { %2406 = shalt.err (!%p2403_p9)
}
 0x13a   : > { %2265 = dma.vmem_to_hbm [thread:$0]  (%p2534_p13), %s1521_s24, 128, %s1523_s25, %s1508_s19  }
 0x13b   : > { %v1491_v23 = vpop.f32.mrf.mxu2 }
 0x13c   : > { %v1504_v24 = vpop.f32.mrf.mxu3 }
 0x13d PF: > { %s1534_s5 = sand.u32 1, %s2437_s12   ;;  %p2633_p10 = scmp.ge.s32.totalorder %s2449_s15, 2 }
 0x13e   : > { %s1535_s20 = scalar_lea.sflag [#allocation4], %s1534_s5 }
 0x13f   : > { %p2276_p11 = pnand %p2633_p10, %p2539_p4 }
 0x141   : > { %p2277_p0 = pneg %p2276_p11 }
 0x143   : > { %2432 = dma.done.wait (%p2277_p0), %s1535_s20, 128  }
 0x144   : > { %2434 = vsyncadd (%p2277_p0), %s1535_s20, 4294967168  ;;  %p17_p13 = scmp.ge.s32.totalorder %s2514_s26, 4   ;;  %s2634_s12 = smov %s2441_s13 }
 0x145   : > { %s2635_s13 = smov %s2445_s14  ;;  %s2636_s14 = smov %s2526_s29 }
 0x146   : > { %s2637_s15 = smov %s2514_s26  ;;  %19 = sbr.rel (!%p17_p13) target bundleno = 6 (0x6), region = 81 }
 0x14b   :  { %1541 = vsyncpa [#allocation3], 1 }
 0x14c   :  { %1543 = vsyncpa [#allocation3 + $0x1], 1 }
 0x14d   :  { %1544 = vsyncpa [#allocation6], 1 }
 0x14e   :  { %1545 = vsyncpa [#allocation4], 1 }
 0x14f   :  { %1547 = vsyncpa [#allocation4 + $0x1], 1 }

</bundles_post_ra>
